<compile_context>
chip_gen: v7x
topology: tpu7x:2x2x1
jax: 0.10.0
libtpu: 0.0.40
codegen_flags: <defaults>
</compile_context>

<pallas_src>
import numpy as np
import jax
import jax.numpy as jnp
from jax.experimental import pallas as pl
from jax.experimental.pallas import tpu as pltpu

# cutoff constants from the module: cutoff_distance=4, cutoff_onset=3.8
_CUT_D = 0.5 * (4.0 - 3.8)          # 0.1
_CUT_R = 4.0 - _CUT_D               # 3.9


def _bond_order_kernel(xT_ref, w_ref, b_ref, src_ref, dst_ref, bo_ref, r_ref,
                       out_ref, e_ref):
    step = pl.program_id(0)

    @pl.when(step == 0)
    def _():
        # Fused node linears (src has bias, dst does not):
        # (8, N_pad) = (8, F) @ (F, N_pad) + bias(8, 1)
        e_ref[...] = (jnp.dot(w_ref[...], xT_ref[...],
                              preferred_element_type=jnp.float32)
                      + b_ref[...])
        out_ref[...] = jnp.zeros_like(out_ref)

    src = src_ref[...]                       # (1, TE) int32
    dst = dst_ref[...]                       # (1, TE) int32
    n_pad = out_ref.shape[1]
    te = src.shape[1]

    # In-register one-hot gather/scatter matrices, (N_pad, TE).
    node_iota = jax.lax.broadcasted_iota(jnp.int32, (n_pad, te), 0)
    oh_src = (node_iota == src).astype(jnp.float32)
    oh_dst = (node_iota == dst).astype(jnp.float32)

    e_cat = e_ref[...]                       # (8, N_pad)
    e_src = e_cat[0:4, :]                    # (4, N_pad)
    e_dst = e_cat[4:8, :]                    # (4, N_pad)

    # g.apply_edges(fn.u_add_v): per-edge params, lane-dense (4, TE).
    pair = (jnp.dot(e_src, oh_src, preferred_element_type=jnp.float32)
            + jnp.dot(e_dst, oh_dst, preferred_element_type=jnp.float32))
    params = jnp.exp(pair)
    a = params[0:1, :]
    b = params[1:2, :]
    c = params[2:3, :]
    d = params[3:4, :]

    r = r_ref[...]                           # (1, TE)
    bo = bo_ref[...]                         # (1, TE)

    f_repulse = a * jnp.exp(-b * r)
    f_attract = c * jnp.exp(-d * r)

    # cutoff(r)
    cut = jnp.where(r < _CUT_R - _CUT_D,
                    jnp.ones_like(r),
                    0.5 - 0.5 * jnp.sin(np.pi * (r - _CUT_R) / (2.0 * _CUT_D)))
    cut = jnp.where(r > _CUT_R + _CUT_D, jnp.zeros_like(r), cut)

    v_pair = cut * (f_repulse - bo * f_attract)          # (1, TE)

    # g.update_all(copy_e, sum): scatter-sum onto destination nodes,
    # contracting over the edge axis -> lane-dense (1, N_pad) accumulator.
    out_ref[...] += jax.lax.dot_general(
        v_pair, oh_dst,
        dimension_numbers=(((1,), (1,)), ((), ())),
        preferred_element_type=jnp.float32)


def _round_up(x, m):
    return ((x + m - 1) // m) * m


def bond_order_interaction(node_features, src_idx, dst_idx,
                           bond_order, bondlength,
                           w_src, b_src, w_dst, *, edge_tile=128):
    """Pallas wrapper. Returns per-node V, shape (N,)."""
    n_nodes, n_feat = node_features.shape
    n_edges = src_idx.shape[0]

    n_pad = _round_up(max(n_nodes, 128), 128)          # lane-dense output row
    e_pad = _round_up(max(n_edges, edge_tile), edge_tile)
    num_tiles = e_pad // edge_tile

    # Fused, pre-transposed weights: (8, F); bias rows 4:8 zero (dst has no bias).
    w_cat_t = jnp.concatenate([w_src, w_dst], axis=1).T.astype(jnp.float32)
    b_cat = jnp.concatenate([b_src.reshape(-1).astype(jnp.float32),
                             jnp.zeros((4,), jnp.float32)]).reshape(8, 1)

    xT = jnp.zeros((n_feat, n_pad), jnp.float32)
    xT = xT.at[:, :n_nodes].set(node_features.T.astype(jnp.float32))

    def pad_edges(v, fill, dtype):
        row = jnp.full((1, e_pad), fill, dtype)
        return row.at[0, :n_edges].set(v.astype(dtype))

    src_p = pad_edges(src_idx, 0, jnp.int32)
    dst_p = pad_edges(dst_idx, 0, jnp.int32)
    bo_p = pad_edges(bond_order, 0.0, jnp.float32)
    # Padded bondlengths sit far beyond the cutoff -> cutoff()==0 -> exactly
    # zero contribution from padded edges.
    r_p = pad_edges(bondlength, 100.0, jnp.float32)

    grid_spec = pltpu.PrefetchScalarGridSpec(
        num_scalar_prefetch=0,
        grid=(num_tiles,),
        in_specs=[
            pl.BlockSpec((n_feat, n_pad), lambda t: (0, 0)),   # x^T, resident
            pl.BlockSpec((8, n_feat), lambda t: (0, 0)),       # fused W^T, resident
            pl.BlockSpec((8, 1), lambda t: (0, 0)),            # fused bias, resident
            pl.BlockSpec((1, edge_tile), lambda t: (0, t)),    # src idx tile
            pl.BlockSpec((1, edge_tile), lambda t: (0, t)),    # dst idx tile
            pl.BlockSpec((1, edge_tile), lambda t: (0, t)),    # bond order tile
            pl.BlockSpec((1, edge_tile), lambda t: (0, t)),    # bondlength tile
        ],
        out_specs=pl.BlockSpec((1, n_pad), lambda t: (0, 0)),  # accumulator
        scratch_shapes=[pltpu.VMEM((8, n_pad), jnp.float32)],  # fused node linears
    )

    # TODO(synk): add a "parallel" grid axis (multi-graph batching / node tiling)
    # to use both TensorCores on v7x; a single small graph has no such axis.
    out = pl.pallas_call(
        _bond_order_kernel,
        out_shape=jax.ShapeDtypeStruct((1, n_pad), jnp.float32),
        grid_spec=grid_spec,
        compiler_params=pltpu.CompilerParams(
            dimension_semantics=("arbitrary",),
            vmem_limit_bytes=32 << 20,
        ),
    )(xT, w_cat_t, b_cat, src_p, dst_p, bo_p, r_p)

    return out[0, :n_nodes]


def _reference(node_features, src_idx, dst_idx, bond_order, bondlength,
               w_src, b_src, w_dst):
    """Pure-JAX reference mirroring the PyTorch/DGL semantics."""
    e_src = node_features @ w_src + b_src
    e_dst = node_features @ w_dst
    pair = e_src[src_idx] + e_dst[dst_idx]
    params = jnp.exp(pair)
    f_rep = params[:, 0] * jnp.exp(-params[:, 1] * bondlength)
    f_att = params[:, 2] * jnp.exp(-params[:, 3] * bondlength)
    cut = jnp.where(bondlength < _CUT_R - _CUT_D,
                    jnp.ones_like(bondlength),
                    0.5 - 0.5 * jnp.sin(np.pi * (bondlength - _CUT_R) / (2 * _CUT_D)))
    cut = jnp.where(bondlength > _CUT_R + _CUT_D, jnp.zeros_like(bondlength), cut)
    v_pair = cut * (f_rep - bond_order * f_att)
    return jnp.zeros((node_features.shape[0],), jnp.float32).at[dst_idx].add(v_pair)


if __name__ == "__main__":
    key = jax.random.PRNGKey(0)
    k1, k2, k3, k4, k5, k6, k7 = jax.random.split(key, 7)

    # Small synthetic graph: N nodes, E directed edges, F latent features.
    # E > 128 so the edge-tiled grid / accumulator path is exercised (2 tiles).
    N, E, F = 16, 200, 32
    PAIR = 4  # self.pair_parameters

    node_features = jax.random.normal(k1, (N, F), dtype=jnp.float32)
    src_idx = jax.random.randint(k2, (E,), 0, N)
    dst_idx = jax.random.randint(k3, (E,), 0, N)
    bond_order = jax.random.uniform(k4, (E,), dtype=jnp.float32)
    bondlength = jax.random.uniform(k5, (E,), minval=1.0, maxval=4.5,
                                    dtype=jnp.float32)

    # Deterministic parameter init (Linear weights stored as (F, 4) for x @ W).
    w_src = 0.05 * jax.random.normal(k6, (F, PAIR), dtype=jnp.float32)
    b_src = jnp.log(jnp.ones((PAIR,), dtype=jnp.float32))   # = zeros, as in __init__
    w_dst = 0.05 * jax.random.normal(k7, (F, PAIR), dtype=jnp.float32)

    out = bond_order_interaction(node_features, src_idx, dst_idx,
                                 bond_order, bondlength, w_src, b_src, w_dst)
    out = jax.block_until_ready(out)

    ref = _reference(node_features, src_idx, dst_idx, bond_order, bondlength,
                     w_src, b_src, w_dst)
    np.testing.assert_allclose(np.asarray(out), np.asarray(ref),
                               rtol=2e-4, atol=1e-5)
    print("KERNEL_OK")
</pallas_src>

<mosaic_0001>
module attributes {stable_mosaic.version = 11 : i64} {
  func.func @_bond_order_kernel(%arg0: i32, %arg1: memref<32x128xf32, #tpu.memory_space<vmem>>, %arg2: memref<8x32xf32, #tpu.memory_space<vmem>>, %arg3: memref<8x1xf32, #tpu.memory_space<vmem>>, %arg4: memref<1x128xi32, #tpu.memory_space<vmem>>, %arg5: memref<1x128xi32, #tpu.memory_space<vmem>>, %arg6: memref<1x128xf32, #tpu.memory_space<vmem>>, %arg7: memref<1x128xf32, #tpu.memory_space<vmem>>, %arg8: memref<1x128xf32, #tpu.memory_space<vmem>>, %arg9: memref<8x128xf32, #tpu.memory_space<vmem>>) attributes {dimension_semantics = [#tpu.dimension_semantics<arbitrary>], iteration_bounds = array<i64: 2>, scalar_prefetch = 0 : i64, scratch_operands = 1 : i64, tpu.core_type = #tpu.core_type<tc>, window_params = [{pipeline_mode = #tpu.pipeline_mode<synchronous>, transform_indices = @transform_0, window_bounds = array<i64: 32, 128>}, {pipeline_mode = #tpu.pipeline_mode<synchronous>, transform_indices = @transform_1, window_bounds = array<i64: 8, 32>}, {pipeline_mode = #tpu.pipeline_mode<synchronous>, transform_indices = @transform_2, window_bounds = array<i64: 8, 1>}, {transform_indices = @transform_3, window_bounds = array<i64: 1, 128>}, {transform_indices = @transform_4, window_bounds = array<i64: 1, 128>}, {transform_indices = @transform_5, window_bounds = array<i64: 1, 128>}, {transform_indices = @transform_6, window_bounds = array<i64: 1, 128>}, {pipeline_mode = #tpu.pipeline_mode<synchronous>, transform_indices = @transform_7, window_bounds = array<i64: 1, 128>}]} {
    %c0_i32 = arith.constant 0 : i32
    %0 = arith.cmpi eq, %arg0, %c0_i32 : i32
    %1 = arith.extui %0 : i1 to i32
    %c0_i32_0 = arith.constant 0 : i32
    %2 = arith.cmpi ne, %1, %c0_i32_0 : i32
    scf.if %2 {
      %c0_27 = arith.constant 0 : index
      %c0_28 = arith.constant 0 : index
      %63 = vector.load %arg2[%c0_27, %c0_28] : memref<8x32xf32, #tpu.memory_space<vmem>>, vector<8x32xf32>
      %c0_29 = arith.constant 0 : index
      %c0_30 = arith.constant 0 : index
      %64 = vector.load %arg1[%c0_29, %c0_30] : memref<32x128xf32, #tpu.memory_space<vmem>>, vector<32x128xf32>
      %cst_31 = arith.constant dense<0.000000e+00> : vector<8x128xf32>
      %65 = tpu.matmul %63, %64, %cst_31 {dimension_numbers = #tpu.dot_dimension_numbers<[1], [0], [0], [1], [0, 0, 1, 1], [], []>} : vector<8x32xf32>, vector<32x128xf32>, vector<8x128xf32> -> vector<8x128xf32>
      %c0_32 = arith.constant 0 : index
      %c0_33 = arith.constant 0 : index
      %66 = vector.load %arg3[%c0_32, %c0_33] : memref<8x1xf32, #tpu.memory_space<vmem>>, vector<8x1xf32>
      %67 = vector.broadcast %66 : vector<8x1xf32> to vector<8x128xf32>
      %68 = arith.addf %65, %67 : vector<8x128xf32>
      %c0_34 = arith.constant 0 : index
      %c0_35 = arith.constant 0 : index
      %69 = vector.load %arg9[%c0_34, %c0_35] : memref<8x128xf32, #tpu.memory_space<vmem>>, vector<8x128xf32>
      tpu.vector_store %arg9[%c0_34, %c0_35], %68 {strides = array<i32>} : memref<8x128xf32, #tpu.memory_space<vmem>>, vector<8x128xf32>,
      %cst_36 = arith.constant 0.000000e+00 : f32
      %70 = vector.broadcast %cst_36 : f32 to vector<1x128xf32>
      %c0_37 = arith.constant 0 : index
      %c0_38 = arith.constant 0 : index
      %71 = vector.load %arg8[%c0_37, %c0_38] : memref<1x128xf32, #tpu.memory_space<vmem>>, vector<1x128xf32>
      tpu.vector_store %arg8[%c0_37, %c0_38], %70 {strides = array<i32>} : memref<1x128xf32, #tpu.memory_space<vmem>>, vector<1x128xf32>,
    } else {
    }
    %c0 = arith.constant 0 : index
    %c0_1 = arith.constant 0 : index
    %3 = vector.load %arg4[%c0, %c0_1] : memref<1x128xi32, #tpu.memory_space<vmem>>, vector<1x128xi32>
    %c0_2 = arith.constant 0 : index
    %c0_3 = arith.constant 0 : index
    %4 = vector.load %arg5[%c0_2, %c0_3] : memref<1x128xi32, #tpu.memory_space<vmem>>, vector<1x128xi32>
    %5 = tpu.iota {dimensions = array<i32: 0>} : vector<128x128xi32>
    %6 = vector.broadcast %3 : vector<1x128xi32> to vector<128x128xi32>
    %7 = arith.cmpi eq, %5, %6 : vector<128x128xi32>
    %8 = arith.extui %7 : vector<128x128xi1> to vector<128x128xi32>
    %9 = arith.sitofp %8 : vector<128x128xi32> to vector<128x128xf32>
    %10 = vector.broadcast %4 : vector<1x128xi32> to vector<128x128xi32>
    %11 = arith.cmpi eq, %5, %10 : vector<128x128xi32>
    %12 = arith.extui %11 : vector<128x128xi1> to vector<128x128xi32>
    %13 = arith.sitofp %12 : vector<128x128xi32> to vector<128x128xf32>
    %c0_4 = arith.constant 0 : index
    %c0_5 = arith.constant 0 : index
    %14 = vector.load %arg9[%c0_4, %c0_5] : memref<8x128xf32, #tpu.memory_space<vmem>>, vector<8x128xf32>
    %15 = vector.extract_strided_slice %14 {offsets = [0, 0], sizes = [4, 128], strides = [1, 1]} : vector<8x128xf32> to vector<4x128xf32>
    %16 = vector.extract_strided_slice %14 {offsets = [4, 0], sizes = [4, 128], strides = [1, 1]} : vector<8x128xf32> to vector<4x128xf32>
    %cst = arith.constant dense<0.000000e+00> : vector<4x128xf32>
    %17 = tpu.matmul %15, %9, %cst {dimension_numbers = #tpu.dot_dimension_numbers<[1], [0], [0], [1], [0, 0, 1, 1], [], []>} : vector<4x128xf32>, vector<128x128xf32>, vector<4x128xf32> -> vector<4x128xf32>
    %cst_6 = arith.constant dense<0.000000e+00> : vector<4x128xf32>
    %18 = tpu.matmul %16, %13, %cst_6 {dimension_numbers = #tpu.dot_dimension_numbers<[1], [0], [0], [1], [0, 0, 1, 1], [], []>} : vector<4x128xf32>, vector<128x128xf32>, vector<4x128xf32> -> vector<4x128xf32>
    %19 = arith.addf %17, %18 : vector<4x128xf32>
    %20 = math.exp %19 : vector<4x128xf32>
    %21 = vector.extract_strided_slice %20 {offsets = [0, 0], sizes = [1, 128], strides = [1, 1]} : vector<4x128xf32> to vector<1x128xf32>
    %22 = vector.extract_strided_slice %20 {offsets = [1, 0], sizes = [1, 128], strides = [1, 1]} : vector<4x128xf32> to vector<1x128xf32>
    %23 = vector.extract_strided_slice %20 {offsets = [2, 0], sizes = [1, 128], strides = [1, 1]} : vector<4x128xf32> to vector<1x128xf32>
    %24 = vector.extract_strided_slice %20 {offsets = [3, 0], sizes = [1, 128], strides = [1, 1]} : vector<4x128xf32> to vector<1x128xf32>
    %c0_7 = arith.constant 0 : index
    %c0_8 = arith.constant 0 : index
    %25 = vector.load %arg7[%c0_7, %c0_8] : memref<1x128xf32, #tpu.memory_space<vmem>>, vector<1x128xf32>
    %c0_9 = arith.constant 0 : index
    %c0_10 = arith.constant 0 : index
    %26 = vector.load %arg6[%c0_9, %c0_10] : memref<1x128xf32, #tpu.memory_space<vmem>>, vector<1x128xf32>
    %cst_11 = arith.constant 0.000000e+00 : f32
    %27 = vector.broadcast %cst_11 : f32 to vector<1x128xf32>
    %28 = arith.subf %27, %22 : vector<1x128xf32>
    %29 = arith.mulf %28, %25 : vector<1x128xf32>
    %30 = math.exp %29 : vector<1x128xf32>
    %31 = arith.mulf %21, %30 : vector<1x128xf32>
    %cst_12 = arith.constant 0.000000e+00 : f32
    %32 = vector.broadcast %cst_12 : f32 to vector<1x128xf32>
    %33 = arith.subf %32, %24 : vector<1x128xf32>
    %34 = arith.mulf %33, %25 : vector<1x128xf32>
    %35 = math.exp %34 : vector<1x128xf32>
    %36 = arith.mulf %23, %35 : vector<1x128xf32>
    %cst_13 = arith.constant 3.800000e+00 : f32
    %37 = vector.broadcast %cst_13 : f32 to vector<1x128xf32>
    %38 = arith.cmpf olt, %25, %37 : vector<1x128xf32>
    %cst_14 = arith.constant 1.000000e+00 : f32
    %39 = vector.broadcast %cst_14 : f32 to vector<1x128xf32>
    %cst_15 = arith.constant 3.900000e+00 : f32
    %40 = vector.broadcast %cst_15 : f32 to vector<1x128xf32>
    %41 = arith.subf %25, %40 : vector<1x128xf32>
    %cst_16 = arith.constant 3.14159274 : f32
    %42 = vector.broadcast %cst_16 : f32 to vector<1x128xf32>
    %43 = arith.mulf %42, %41 : vector<1x128xf32>
    %cst_17 = arith.constant 2.000000e-01 : f32
    %44 = vector.broadcast %cst_17 : f32 to vector<1x128xf32>
    %45 = arith.divf %43, %44 : vector<1x128xf32>
    %46 = math.sin %45 : vector<1x128xf32>
    %cst_18 = arith.constant 5.000000e-01 : f32
    %47 = vector.broadcast %cst_18 : f32 to vector<1x128xf32>
    %48 = arith.mulf %47, %46 : vector<1x128xf32>
    %cst_19 = arith.constant 5.000000e-01 : f32
    %49 = vector.broadcast %cst_19 : f32 to vector<1x128xf32>
    %50 = arith.subf %49, %48 : vector<1x128xf32>
    %51 = arith.select %38, %39, %50 : vector<1x128xi1>, vector<1x128xf32>
    %cst_20 = arith.constant 4.000000e+00 : f32
    %52 = vector.broadcast %cst_20 : f32 to vector<1x128xf32>
    %53 = arith.cmpf ogt, %25, %52 : vector<1x128xf32>
    %cst_21 = arith.constant 0.000000e+00 : f32
    %54 = vector.broadcast %cst_21 : f32 to vector<1x128xf32>
    %55 = arith.select %53, %54, %51 : vector<1x128xi1>, vector<1x128xf32>
    %56 = arith.mulf %26, %36 : vector<1x128xf32>
    %57 = arith.subf %31, %56 : vector<1x128xf32>
    %58 = arith.mulf %55, %57 : vector<1x128xf32>
    %c0_22 = arith.constant 0 : index
    %c0_23 = arith.constant 0 : index
    %59 = vector.load %arg8[%c0_22, %c0_23] : memref<1x128xf32, #tpu.memory_space<vmem>>, vector<1x128xf32>
    %cst_24 = arith.constant dense<0.000000e+00> : vector<1x128xf32>
    %60 = tpu.matmul %58, %13, %cst_24 {dimension_numbers = #tpu.dot_dimension_numbers<[1], [1], [0], [0], [0, 0, 1, 0], [], []>} : vector<1x128xf32>, vector<128x128xf32>, vector<1x128xf32> -> vector<1x128xf32>
    %61 = arith.addf %59, %60 : vector<1x128xf32>
    %c0_25 = arith.constant 0 : index
    %c0_26 = arith.constant 0 : index
    %62 = vector.load %arg8[%c0_25, %c0_26] : memref<1x128xf32, #tpu.memory_space<vmem>>, vector<1x128xf32>
    tpu.vector_store %arg8[%c0_25, %c0_26], %61 {strides = array<i32>} : memref<1x128xf32, #tpu.memory_space<vmem>>, vector<1x128xf32>,
    return
  }
  func.func @transform_0(%arg0: i32) -> (i32, i32) {
    %c0_i32 = arith.constant 0 : i32
    %c0_i32_0 = arith.constant 0 : i32
    %c0_i32_1 = arith.constant 0 : i32
    return %c0_i32, %c0_i32_0 : i32, i32
  }
  func.func @transform_1(%arg0: i32) -> (i32, i32) {
    %c0_i32 = arith.constant 0 : i32
    %c0_i32_0 = arith.constant 0 : i32
    %c0_i32_1 = arith.constant 0 : i32
    return %c0_i32, %c0_i32_0 : i32, i32
  }
  func.func @transform_2(%arg0: i32) -> (i32, i32) {
    %c0_i32 = arith.constant 0 : i32
    %c0_i32_0 = arith.constant 0 : i32
    %c0_i32_1 = arith.constant 0 : i32
    return %c0_i32, %c0_i32_0 : i32, i32
  }
  func.func @transform_3(%arg0: i32) -> (i32, i32) {
    %c0_i32 = arith.constant 0 : i32
    %c0_i32_0 = arith.constant 0 : i32
    return %c0_i32, %arg0 : i32, i32
  }
  func.func @transform_4(%arg0: i32) -> (i32, i32) {
    %c0_i32 = arith.constant 0 : i32
    %c0_i32_0 = arith.constant 0 : i32
    return %c0_i32, %arg0 : i32, i32
  }
  func.func @transform_5(%arg0: i32) -> (i32, i32) {
    %c0_i32 = arith.constant 0 : i32
    %c0_i32_0 = arith.constant 0 : i32
    return %c0_i32, %arg0 : i32, i32
  }
  func.func @transform_6(%arg0: i32) -> (i32, i32) {
    %c0_i32 = arith.constant 0 : i32
    %c0_i32_0 = arith.constant 0 : i32
    return %c0_i32, %arg0 : i32, i32
  }
  func.func @transform_7(%arg0: i32) -> (i32, i32) {
    %c0_i32 = arith.constant 0 : i32
    %c0_i32_0 = arith.constant 0 : i32
    %c0_i32_1 = arith.constant 0 : i32
    return %c0_i32, %c0_i32_0 : i32, i32
  }
}

</mosaic_0001>

<bundles_post_ra>
// kernel: tpu_custom_call.1
= control target key start
LH: loop header
LB: loop body
LE: loop exit
PB: predicated region body
PF: predicated region fallthrough
CT: control target
= control target key end

     0   :  { %12 = vsyncpa [#allocation4], 0  ;;  %s1869_s0 = inlined_call_operand.hbm [shape: f32[32,128], index: 0, kind: input, shape index: {}]   ;;  %s1870_s1 = inlined_call_operand.vmem [shape: f32[8,32], index: 1, kind: input, shape index: {}]   ;;  %s1871_s2 = inlined_call_operand.vmem [shape: f32[8,1], index: 2, kind: input, shape index: {}]   ;;  %s1872_s3 = inlined_call_operand.vmem [shape: s32[1,256], index: 3, kind: input, shape index: {}]   ;;  %s1873_s4 = inlined_call_operand.vmem [shape: s32[1,256], index: 4, kind: input, shape index: {}]   ;;  %s1874_s5 = inlined_call_operand.vmem [shape: f32[1,256], index: 5, kind: input, shape index: {}]   ;;  %s1875_s6 = inlined_call_operand.vmem [shape: f32[1,256], index: 6, kind: input, shape index: {}]   ;;  %s1876_s7 = inlined_call_operand.hbm [shape: f32[1,128], index: 7, kind: output, shape index: {}]  }
   0x1   :  { %13 = vsyncpa [#allocation5], 0  ;;  %s1517_s24 = smov 0  }
   0x2 LB: > { %s1523_s25 = sadd.s32 4294967295, %s1456_s24   ;;  %p982_p0 = scmp.ge.s32.totalorder %s1456_s24, 1  ;;  %s1456_s24 = sphi %s1517_s24, %s19_s24  }
   0x3   : > { %p212_p1 = scmp.lt.s32.totalorder %s1456_s24, 3  ;;  %s1458_s26 = smov [#allocation3]  }
   0x4   : > { %s224_s27 = sshll.u32 %s1458_s26, 4  ;;  %p1877_p4 = scmp.eq.s32.totalorder %s1523_s25, 0  ;;  %s225_s27 = int_to_ptr.vmem [resolvable:$true] %s224_s27 }
   0x5   : > { %p1528_p3 = pnand %p982_p0, %p212_p1  ;;  %s1388_s9 = scalar_lea.hbm %s1869_s0, 512 }
   0x6   : > { %p1389_p7 = scmp.ne.s32.totalorder %s1869_s0, %s1388_s9  ;;  %p1395_p11 = scmp.lt.u32.totalorder %s1388_s9, %s1869_s0 }
   0x7   : > { %s1879_s28 = scalar_select %p1528_p3, 1, 0 }
   0x8   : > { %p1344_p5 = pneg %p1528_p3 }
   0xa   : > { %p1537_p6 = pnand %p1877_p4, %p1344_p5 }
   0xc   : > { %p1390_p8 = pneg %p1537_p6 }
   0xe   : > { %p1391_p9 = pnand %p1390_p8, %p1389_p7 }
  0x10   : > { %p1392_p10 = pneg %p1391_p9 }
  0x12   : > { %p1397_p12 = pnand %p1395_p11, %p1392_p10 }
  0x14   : > { %1400 = shalt.err (!%p1397_p12)
}
  0x15   : > { %s1401_s14 = scalar_lea.vmem %s225_s27, 512  ;;  %p1409_p5 = scmp.lt.s32.totalorder %s225_s27, %s225_s27 }
  0x16   : > { %p1402_p13 = scmp.ne.s32.totalorder %s225_s27, %s1401_s14  ;;  %p1410_p2 = scmp.lt.s32.totalorder %s1401_s14, %s1401_s14 }
  0x18   : > { %p1404_p0 = pnand %p1402_p13, %p1390_p8  ;;  %p1411_p4 = por %p1410_p2, %p1409_p5 }
  0x1a   : > { %p1405_p1 = pneg %p1404_p0 }
  0x1c   : > { %p1412_p3 = pnand %p1411_p4, %p1405_p1 }
  0x1e   : > { %1415 = shalt.err (!%p1412_p3)
}
  0x1f   : > { %s1459_s15 = smov 128   ;;  %s1460_s16 = smov 8  }
  0x20   : > { %1347 = dma.hbm_to_vmem [thread:$0]  (!%p1537_p6), %s1869_s0, 512, %s225_s27, [#allocation4], %s1459_s15, %s1459_s15, %s1460_s16  }
  0x21   : > { %p1881_p7 = scmp.ne.s32.totalorder %s1879_s28, 0 }
  0x22   : > { %p1882_p9 = scmp.eq.s32.totalorder (!%p1881_p7), %s1523_s25, 0 }
  0x23   : > { %270 = sbr.rel (%p1881_p7) target bundleno = 828 (0x33c), region = 48 }
  0x2a   : > { %1447 = dma.done.wait (%p1882_p9), [#allocation4], 512   ;;  %p1883_p8 = pmov %p1882_p9 }
  0x2b   : > { %p304_p2 = scmp.lt.s32.totalorder %s1523_s25, 1  ;;  %p1884_p3 = scmp.ne.s32.totalorder %s1523_s25, 0 }
  0x2c   : > { %1449 = vsyncadd (%p1883_p8), [#allocation4], 4294966784  ;;  %v321_v0 = vld [vmem:[#allocation3] sm:$0xff] (!%p1884_p3)  ;;  %v322_v1 = vld [vmem:[#allocation3 + $0x8] sm:$0xff] (!%p1884_p3)  ;;  %v1461_v3 = vmov (!%p1884_p3), 0.0|0.0   ;;  %vm1462_vm0 = vmmov (!%p1884_p3), 0  }
  0x2d   : > { %s1565_s19 = scalar_select %p304_p2, %s1523_s25, 1 }
  0x2e   : > { %319 = sbr.rel (%p1884_p3) target bundleno = 270 (0x10e), region = 56  ;;  %v323_v2 = vld [vmem:[#allocation3 + $0x10] sm:$0xff] (!%p1884_p3)  ;;  %1252 = vmatprep.subr.bf16.mxu0 (!%p1884_p3), %v1461_v3  ;;  %v1253_v4 = vpack.c.bf16 (!%p1884_p3), %v322_v1, %v321_v0  ;;  %v324_v5 = vld [vmem:[#allocation3 + $0x18] sm:$0xff] (!%p1884_p3)  ;;  %v1463_v6 = vmov (!%p1884_p3), 0.0   ;;  %v1464_v8 = vmov (!%p1884_p3), 0   ;;  %vm331_vm1 = vcmask (!%p1884_p3), 261120  }
  0x2f   : > { %s306_s22 = scalar_lea.vmem %s1872_s3, %s1565_s19  ;;  %s309_s27 = scalar_lea.vmem %s1873_s4, %s1565_s19  ;;  %1144 = vmatprep.mubr.msk.f32.mxu0 (!%p1884_p3), %vm1462_vm0, %v1463_v6  ;;  %406 = vst [vmem:[#allocation6] sm:$0x1] (!%p1884_p3), %v1463_v6  ;;  %v325_v7 = vld [vmem:[%s1871_s2] sm:$0xff] (!%p1884_p3)  ;;  %1379 = vset.pattern.permute.xlu0 (!%p1884_p3), %v1464_v8  ;;  %v1256_v9 = vpack.c.bf16 (!%p1884_p3), %v324_v5, %v323_v2 }
  0x30   : > { %s312_s30 = scalar_lea.vmem %s1874_s5, %s1565_s19  ;;  %s315_s10 = scalar_lea.vmem %s1875_s6, %s1565_s19  ;;  %1254 = vmatpush3.bf16.msra.mxu0 (!%p1884_p3), %v1253_v4  ;;  %328 = vperm.xlu0 (!%p1884_p3), %1379, %v325_v7   ;;  %v320_v10 = vld [vmem:[%s1870_s1] sm:$0xff] (!%p1884_p3) }
  0x31   : > { %1255 = vmatprep.subr.bf16.mxu0 (!%p1884_p3), %v1461_v3 }
  0x34   : > { %1257 = vmatpush3.bf16.msra.mxu0 (!%p1884_p3), %v1256_v9 }
  0x37   : > { %1145 = vmatmul.mubr.msk.f32.vlgmr.msra.gmra.mrb[0].mxu0 %vm331_vm1, %v320_v10 }
  0xaf   : > { %v329_v11 = vpop.permute.xlu0 %328 }
 0x10a   : > { %v401_v12 = vpop.f32.mrb[0].mxu0 }
 0x10b   : > { %v402_v13 = vadd.f32 %v401_v12, %v329_v11  ;;  %v1146_v14 = vpop.f32.mrb[1].mxu0 }
 0x10d   : > { %405 = vst [vmem:[#allocation2] sm:$0xff] %v402_v13 }
 0x10e PF: > { %v409_v15 = vlaneseq  ;;  %v1465_v16 = vmov 0.0|0.0   ;;  %v1597_v17 = vld [vmem:[%s309_s27] ss:$0 sm:$0xff]  ;;  %vm1466_vm2 = vmmov 0   ;;  %v1467_v19 = vmov 0.0   ;;  %s1476_s26 = smov [#allocation6]  }
 0x10f   : > { %1258 = vmatprep.subr.bf16.mxu0 %v1465_v16  ;;  %1306 = vmatprep.subr.bf16.mxu1 %v1465_v16  ;;  %v1468_v25 = vmov 1.0|1.0   ;;  %v989_v41 = vld [vmem:[%s306_s22] ss:$0 sm:$0xff]  ;;  %v1469_v56 = vmov 2102212464  }
 0x110   : > { %v1600_v18 = vshrl.u32 %v409_v15, 7  ;;  %1179 = vmatprep.mubr.msk.f32.mxu0 %vm1466_vm2, %v1467_v19  ;;  %1249 = vmatprep.mubr.msk.f32.mxu1 %vm1466_vm2, %v1467_v19  ;;  %v1797_v45 = vld [vmem:[%s315_s10] sm:$0x1]  ;;  %v1470_v58 = vmov 920167782   ;;  %s906_s27 = sshll.u32 %s1476_s26, 4  ;;  %s907_s27 = int_to_ptr.vmem [resolvable:$true] %s906_s27 }
 0x111   : > { %v1055_v46 = vadd.f32 -3.9, %v1797_v45  ;;  %v1471_v63 = vmov 1326507024   ;;  %v1472_v1 = vmov 683565275   ;;  %p1423_p12 = scmp.lt.s32.totalorder %s907_s27, %s907_s27 }
 0x112   : > { %v1607_v20 = vadd.s32 8, %v1600_v18  ;;  %vm482_vm3 = vcmp.eq.s32.totalorder %v1600_v18, %v1597_v17  ;;  %v1612_v21 = vadd.s32 16, %v1600_v18  ;;  %v1615_v22 = vadd.s32 24, %v1600_v18  ;;  %p1350_p4 = scmp.eq.s32.totalorder %s1523_s25, 1  ;;  %s1416_s19 = scalar_lea.vmem %s907_s27, 16 }
 0x113   : > { %v1618_v23 = vadd.s32 32, %v1600_v18  ;;  %v1627_v24 = vadd.s32 40, %v1600_v18  ;;  %v1638_v26 = vadd.s32 48, %v1600_v18  ;;  %v1641_v27 = vadd.s32 56, %v1600_v18  ;;  %p1417_p6 = scmp.ne.s32.totalorder %s907_s27, %s1416_s19  ;;  %s1422_s28 = scalar_lea.vmem %s907_s27, 32 }
 0x114   : > { %vm483_vm4 = vcmp.eq.s32.totalorder %v1607_v20, %v1597_v17  ;;  %vm484_vm5 = vcmp.eq.s32.totalorder %v1612_v21, %v1597_v17  ;;  %vm485_vm6 = vcmp.eq.s32.totalorder %v1615_v22, %v1597_v17  ;;  %v1654_v29 = vadd.s32 64, %v1600_v18  ;;  %v530_v42 = vld [vmem:[#allocation2] sm:$0xff]  ;;  %p1424_p13 = scmp.lt.s32.totalorder %s1422_s28, %s1416_s19 }
 0x115   : > { %vm1259_vm7 = vmpackc.low %vm483_vm4, %vm482_vm3  ;;  %vm486_vm9 = vcmp.eq.s32.totalorder %v1618_v23, %v1597_v17  ;;  %vm487_vm10 = vcmp.eq.s32.totalorder %v1627_v24, %v1597_v17  ;;  %vm488_vm12 = vcmp.eq.s32.totalorder %v1638_v26, %v1597_v17  ;;  %vm489_vm13 = vcmp.eq.s32.totalorder %v1641_v27, %v1597_v17  ;;  %p1418_p10 = pnand %p1417_p6, %p1350_p4 }
 0x116   : > { %1260 = vmatpush3.bf16.msk.msra.mxu0 %vm1259_vm7, %v1468_v25  ;;  %1308 = vmatpush3.bf16.xpose.msk.msra.mxu1 %vm1259_vm7, %v1468_v25  ;;  %vm1262_vm8 = vmpackc.low %vm485_vm6, %vm484_vm5  ;;  %v1657_v30 = vadd.s32 72, %v1600_v18  ;;  %vm490_vm15 = vcmp.eq.s32.totalorder %v1654_v29, %v1597_v17  ;;  %v1674_v32 = vadd.s32 80, %v1600_v18  ;;  %v1677_v33 = vadd.s32 88, %v1600_v18  ;;  %p1425_p0 = por %p1424_p13, %p1423_p12 }
 0x117   : > { %1261 = vmatprep.subr.bf16.mxu0 %v1465_v16  ;;  %1309 = vmatprep.subr.bf16.mxu1 %v1465_v16  ;;  %vm1645_vm11 = vmpackc.low %vm487_vm10, %vm486_vm9  ;;  %v1692_v35 = vadd.s32 96, %v1600_v18  ;;  %v1695_v36 = vadd.s32 104, %v1600_v18  ;;  %v424_v38 = vadd.s32 112, %v1600_v18  ;;  %v425_v39 = vadd.s32 120, %v1600_v18  ;;  %p1419_p11 = pneg %p1418_p10 }
 0x118   : > { %vm1664_vm14 = vmpackc.low %vm489_vm13, %vm488_vm12  ;;  %vm491_vm0 = vcmp.eq.s32.totalorder %v1657_v30, %v1597_v17  ;;  %vm492_vm3 = vcmp.eq.s32.totalorder %v1674_v32, %v1597_v17  ;;  %vm493_vm4 = vcmp.eq.s32.totalorder %v1677_v33, %v1597_v17  ;;  %vm430_vm12 = vcmp.eq.s32.totalorder %v1600_v18, %v989_v41 }
 0x119   : > { %vm1683_vm1 = vmpackc.low %vm491_vm0, %vm490_vm15  ;;  %vm494_vm6 = vcmp.eq.s32.totalorder %v1692_v35, %v1597_v17  ;;  %vm495_vm7 = vcmp.eq.s32.totalorder %v1695_v36, %v1597_v17  ;;  %vm496_vm9 = vcmp.eq.s32.totalorder %v424_v38, %v1597_v17  ;;  %vm497_vm10 = vcmp.eq.s32.totalorder %v425_v39, %v1597_v17  ;;  %p1426_p1 = pnand %p1425_p0, %p1419_p11 }
 0x11a   : > { %1263 = vmatpush3.bf16.msk.msra.mxu0 %vm1262_vm8, %v1468_v25  ;;  %vm1704_vm5 = vmpackc.low %vm493_vm4, %vm492_vm3  ;;  %vm431_vm13 = vcmp.eq.s32.totalorder %v1607_v20, %v989_v41  ;;  %v532_v44 = vrot.slane %v530_v42, 4  ;;  %vm432_vm15 = vcmp.eq.s32.totalorder %v1612_v21, %v989_v41  ;;  %vm433_vm0 = vcmp.eq.s32.totalorder %v1615_v22, %v989_v41 }
 0x11b   : > { %1264 = vmatprep.subr.bf16.mxu0 %v1465_v16  ;;  %vm1286_vm3 = vmpackc.low %vm433_vm0, %vm432_vm15  ;;  %vm434_vm4 = vcmp.eq.s32.totalorder %v1618_v23, %v989_v41  ;;  %vm441_vm15 = vcmp.eq.s32.totalorder %v1677_v33, %v989_v41  ;;  %vm442_vm0 = vcmp.eq.s32.totalorder %v1692_v35, %v989_v41  ;;  %v694_v47 = vmul.f32 3.1415927, %v1055_v46 }
 0x11c   : > { %v1473_v3 = vmov 2475754826   ;;  %v1474_v6 = vmov 2131351028  }
 0x11d   : > { %v1800_v48 = vmul.f32 5.0, %v694_v47 }
 0x11e   : > { %1266 = vmatpush3.bf16.msk.msra.mxu0 %vm1645_vm11, %v1468_v25  ;;  %1311 = vmatpush3.bf16.xpose.msk.msra.mxu1 %vm1262_vm8, %v1468_v25  ;;  %vm1719_vm8 = vmpackc.low %vm495_vm7, %vm494_vm6  ;;  %vm435_vm6 = vcmp.eq.s32.totalorder %v1627_v24, %v989_v41 }
 0x11f   : > { %1267 = vmatprep.subr.bf16.mxu0 %v1465_v16  ;;  %1312 = vmatprep.subr.bf16.mxu1 %v1465_v16  ;;  %vm1289_vm7 = vmpackc.low %vm435_vm6, %vm434_vm4  ;;  %vm444_vm6 = vcmp.eq.s32.totalorder %v424_v38, %v989_v41  ;;  %v700_v49 = vand.u32 2139095040, %v1800_v48  ;;  %v697_v60 = vand.u32 2147483647, %v1800_v48 }
 0x121   : > { %v701_v50 = vshrl.u32 %v700_v49, 23  ;;  %v704_v11 = vand.u32 8388607, %v697_v60 }
 0x122   : > { %1269 = vmatpush3.bf16.msk.msra.mxu0 %vm1664_vm14, %v1468_v25 }
 0x123   : > { %1270 = vmatprep.subr.bf16.mxu0 %v1465_v16  ;;  %v1056_v51 = vadd.s32 4294967169, %v701_v50  ;;  %v705_v17 = vor.u32 8388608, %v704_v11 }
 0x125   : > { %v707_v52 = vadd.s32 1, %v1056_v51  ;;  %v745_v24 = vshll.u32 %v705_v17, 8 }
 0x126   : > { %1272 = vmatpush3.bf16.msk.msra.mxu0 %vm1683_vm1, %v1468_v25  ;;  %1314 = vmatpush3.bf16.xpose.msk.msra.mxu1 %vm1645_vm11, %v1468_v25  ;;  %vm1737_vm11 = vmpackc.low %vm497_vm10, %vm496_vm9  ;;  %vm437_vm9 = vcmp.eq.s32.totalorder %v1641_v27, %v989_v41  ;;  %vm438_vm10 = vcmp.eq.s32.totalorder %v1654_v29, %v989_v41 }
 0x127   : > { %1273 = vmatprep.subr.bf16.mxu0 %v1465_v16  ;;  %1315 = vmatprep.subr.bf16.mxu1 %v1465_v16 }
 0x12a   : > { %1275 = vmatpush3.bf16.msk.msra.mxu0 %vm1704_vm5, %v1468_v25 }
 0x12b   : > { %1276 = vmatprep.subr.bf16.mxu0 %v1465_v16 }
 0x12e   : > { %1278 = vmatpush3.bf16.msk.msra.mxu0 %vm1719_vm8, %v1468_v25  ;;  %1317 = vmatpush3.bf16.xpose.msk.msra.mxu1 %vm1664_vm14, %v1468_v25  ;;  %vm1283_vm14 = vmpackc.low %vm431_vm13, %vm430_vm12  ;;  %vm439_vm12 = vcmp.eq.s32.totalorder %v1657_v30, %v989_v41 }
 0x12f   : > { %1279 = vmatprep.subr.bf16.mxu0 %v1465_v16  ;;  %1318 = vmatprep.subr.bf16.mxu1 %v1465_v16  ;;  %vm1295_vm13 = vmpackc.low %vm439_vm12, %vm438_vm10 }
 0x132   : > { %1281 = vmatpush3.bf16.msk.msra.mxu0 %vm1737_vm11, %v1468_v25 }
 0x133   : > { %1282 = vmatprep.subr.bf16.mxu0 %v1465_v16 }
 0x135   : > { %1180 = vmatmul.mubr.f32.vlgmr.msra.gmra.mrb[0].mxu0 %v532_v44 }
 0x136   : > { %1284 = vmatpush3.bf16.msk.msra.mxu0 %vm1283_vm14, %v1468_v25  ;;  %1214 = vmatprep.mubr.msk.f32.mxu0 %vm1466_vm2, %v1467_v19  ;;  %vm436_vm2 = vcmp.eq.s32.totalorder %v1638_v26, %v989_v41  ;;  %vm440_vm14 = vcmp.eq.s32.totalorder %v1674_v32, %v989_v41 }
 0x137   : > { %1285 = vmatprep.subr.bf16.mxu0 %v1465_v16  ;;  %1320 = vmatpush3.bf16.xpose.msk.msra.mxu1 %vm1683_vm1, %v1468_v25  ;;  %vm1292_vm1 = vmpackc.low %vm437_vm9, %vm436_vm2 }
 0x138   : > { %1321 = vmatprep.subr.bf16.mxu1 %v1465_v16 }
 0x13a   : > { %1287 = vmatpush3.bf16.msk.msra.mxu0 %vm1286_vm3, %v1468_v25  ;;  %vm443_vm3 = vcmp.eq.s32.totalorder %v1695_v36, %v989_v41 }
 0x13b   : > { %1288 = vmatprep.subr.bf16.mxu0 %v1465_v16  ;;  %vm1301_vm4 = vmpackc.low %vm443_vm3, %vm442_vm0 }
 0x13e   : > { %1290 = vmatpush3.bf16.msk.msra.mxu0 %vm1289_vm7, %v1468_v25  ;;  %vm445_vm7 = vcmp.eq.s32.totalorder %v425_v39, %v989_v41 }
 0x13f   : > { %1291 = vmatprep.subr.bf16.mxu0 %v1465_v16  ;;  %1323 = vmatpush3.bf16.xpose.msk.msra.mxu1 %vm1704_vm5, %v1468_v25  ;;  %vm1298_vm5 = vmpackc.low %vm441_vm15, %vm440_vm14  ;;  %vm699_vm14 = vcmp.lt.s32.totalorder %v1800_v48, 0  ;;  %vm698_vm15 = vcmp.le.f32.partialorder %v697_v60, 0.7853982 }
 0x140   : > { %1324 = vmatprep.subr.bf16.mxu1 %v1465_v16  ;;  %vm1304_vm2 = vmpackc.low %vm445_vm7, %vm444_vm6  ;;  %vm692_vm6 = vcmp.lt.f32.partialorder %v1797_v45, 3.8  ;;  %vm804_vm7 = vcmp.gt.f32.partialorder %v1797_v45, 4.0 }
 0x142   : > { %1293 = vmatpush3.bf16.msk.msra.mxu0 %vm1292_vm1, %v1468_v25 }
 0x143   : > { %1294 = vmatprep.subr.bf16.mxu0 %v1465_v16 }
 0x146   : > { %1296 = vmatpush3.bf16.msk.msra.mxu0 %vm1295_vm13, %v1468_v25 }
 0x147   : > { %1297 = vmatprep.subr.bf16.mxu0 %v1465_v16  ;;  %1326 = vmatpush3.bf16.xpose.msk.msra.mxu1 %vm1719_vm8, %v1468_v25  ;;  %vm708_vm8 = vcmp.gt.s32.totalorder %v707_v52, 0 }
 0x148   : > { %1327 = vmatprep.subr.bf16.mxu1 %v1465_v16  ;;  %v709_v53 = vsel %vm708_vm8, %v707_v52, 0 }
 0x149   : > { %v711_v54 = vand.u32 31, %v709_v53  ;;  %v710_v61 = vshrl.u32 %v709_v53, 5 }
 0x14a   : > { %1299 = vmatpush3.bf16.msk.msra.mxu0 %vm1298_vm5, %v1468_v25 }
 0x14b   : > { %1300 = vmatprep.subr.bf16.mxu0 %v1465_v16  ;;  %v712_v55 = vsub.s32 32, %v711_v54  ;;  %v723_v57 = vshll.u32 %v1469_v56, %v711_v54  ;;  %v726_v62 = vshll.u32 %v1470_v58, %v711_v54  ;;  %v714_v2 = vshll.u32 %v1472_v1, %v711_v54 }
 0x14c   : > { %v717_v5 = vshll.u32 %v1473_v3, %v711_v54  ;;  %v720_v8 = vshll.u32 %v1474_v6, %v711_v54  ;;  %vm729_vm9 = vcmp.lt.s32.totalorder %v710_v61, 1  ;;  %vm731_vm1 = vcmp.lt.s32.totalorder %v710_v61, 3 }
 0x14d   : > { %v724_v59 = vshrl.u32 %v1470_v58, %v712_v55  ;;  %v727_v0 = vshrl.u32 %v1471_v63, %v712_v55  ;;  %v715_v4 = vshrl.u32 %v1473_v3, %v712_v55  ;;  %v718_v7 = vshrl.u32 %v1474_v6, %v712_v55 }
 0x14e   : > { %1302 = vmatpush3.bf16.msk.msra.mxu0 %vm1301_vm4, %v1468_v25  ;;  %v721_v9 = vshrl.u32 %v1469_v56, %v712_v55  ;;  %vm730_vm10 = vcmp.lt.s32.totalorder %v710_v61, 2  ;;  %v713_v29 = vshrl.u32 %v1472_v1, %v712_v55  ;;  %vm789_vm4 = vweird.f32 %v1800_v48 }
 0x14f   : > { %1303 = vmatprep.subr.bf16.mxu0 %v1465_v16  ;;  %1329 = vmatpush3.bf16.xpose.msk.msra.mxu1 %vm1737_vm11, %v1468_v25  ;;  %v725_v10 = vor.u32 %v724_v59, %v723_v57  ;;  %v728_v12 = vor.u32 %v727_v0, %v726_v62  ;;  %vm732_vm11 = vcmp.lt.s32.totalorder %v710_v61, 4  ;;  %v716_v13 = vor.u32 %v715_v4, %v714_v2 }
 0x150   : > { %v719_v14 = vor.u32 %v718_v7, %v717_v5  ;;  %v722_v15 = vor.u32 %v721_v9, %v720_v8  ;;  %v682_v8 = vsub.s32 0, %v1600_v18 }
 0x151   : > { %v738_v16 = vsel %vm732_vm11, %v725_v10, 920167782  ;;  %v742_v19 = vsel %vm732_vm11, %v728_v12, 1326507024  ;;  %v733_v33 = vsel %vm729_vm9, %v713_v29, %v716_v13 }
 0x152   : > { %1305 = vmatpush3.bf16.msk.msra.mxu0 %vm1304_vm2, %v1468_v25  ;;  %v737_v20 = vsel %vm729_vm9, %v716_v13, %v719_v14  ;;  %v739_v21 = vsel %vm731_vm1, %v722_v15, %v738_v16  ;;  %v741_v22 = vsel %vm729_vm9, %v719_v14, %v722_v15  ;;  %v743_v23 = vsel %vm731_vm1, %v725_v10, %v742_v19 }
 0x153   : > { %v740_v25 = vsel %vm730_vm10, %v737_v20, %v739_v21  ;;  %v744_v26 = vsel %vm730_vm10, %v741_v22, %v743_v23  ;;  %v734_v32 = vsel %vm732_vm11, %v722_v15, 2102212464  ;;  %v683_v11 = vrot.slane %v1797_v45, %v682_v8 }
 0x154   : > { %v1814_v27 = vmul.u32.u64.low %v745_v24, %v740_v25  ;;  %v1815_v28 = vmul.u32.u64.high %v745_v24, %v740_v25, %v1814_v27  ;;  %v1817_v30 = vmul.u32.u64.low %v745_v24, %v744_v26  ;;  %v1818_v31 = vmul.u32.u64.high %v745_v24, %v744_v26, %v1817_v30 }
 0x155   : > { %1215 = vmatmul.mubr.f32.vlgmr.msra.gmra.mrb[0].mxu0 %v530_v42  ;;  %v735_v34 = vsel %vm731_vm1, %v719_v14, %v734_v32  ;;  %v1475_v23 = vmov 1966171168  }
 0x156   : > { %v736_v35 = vsel %vm730_vm10, %v733_v33, %v735_v34  ;;  %v755_v36 = vadd.s32 1, %v1815_v28  ;;  %vm754_vm12 = vc.u32 %v1818_v31, %v1814_v27  ;;  %v753_v52 = vadd.s32 %v1814_v27, %v1818_v31 }
 0x157   : > { %v752_v37 = vmul.u32 %v745_v24, %v736_v35  ;;  %v808_v24 = vunpack.c.l.s4 %v1475_v23 }
 0x158   : > { %v756_v38 = vsel %vm754_vm12, %v755_v36, %v1815_v28 }
 0x159   : > { %v757_v39 = vadd.s32 %v756_v38, %v752_v37  ;;  %v809_v26 = vunpack.c.0.s8 %v808_v24 }
 0x15b   : > { %v758_v40 = vadd.s32 536870912, %v757_v39  ;;  %v812_v31 = vsub.s32 %v809_v26, %v1600_v18 }
 0x15d   : > { %v759_v41 = vshrl.u32 %v758_v40, 30 }
 0x15f   : > { %v760_v42 = vshll.u32 %v759_v41, 30  ;;  %v783_v5 = vsub.s32 4, %v759_v41 }
 0x161   : > { %v761_v43 = vsub.s32 %v757_v39, %v760_v42  ;;  %v784_v7 = vsel %vm699_vm14, %v783_v5, %v759_v41  ;;  %v826_v41 = vld [vmem:[#allocation6] sm:$0x1] }
 0x162   : > { %v786_v9 = vsel %vm698_vm15, 0, %v784_v7 }
 0x163   : > { %v763_v44 = vsub.s32 0, %v761_v43  ;;  %v790_v10 = vadd.s32 3, %v786_v9 }
 0x165   : > { %v1057_v46 = vmin.u32 %v763_v44, %v761_v43  ;;  %v791_v15 = vand.u32 3, %v790_v10 }
 0x167   : > { %v765_v47 = vclz %v1057_v46  ;;  %vm793_vm5 = vcmp.eq.s32.totalorder %v791_v15, 0  ;;  %vm796_vm0 = vcmp.eq.s32.totalorder %v791_v15, 2  ;;  %vm792_vm3 = vcmp.lt.s32.totalorder %v791_v15, 2 }
 0x169   : > { %v1058_v49 = vadd.s32 4294967294, %v765_v47 }
 0x16b   : > { %vm1059_vm13 = vcmp.lt.s32.totalorder %v1058_v49, 0 }
 0x16c   : > { %v768_v50 = vsel %vm1059_vm13, 0, %v1058_v49 }
 0x16d   : > { %v773_v51 = vsub.s32 4294967266, %v768_v50  ;;  %v769_v53 = vsub.s32 32, %v768_v50  ;;  %v770_v55 = vshll.u32 %v761_v43, %v768_v50 }
 0x16f   : > { %v774_v54 = vadd.s32 127, %v773_v51  ;;  %v771_v56 = vshrl.u32 %v753_v52, %v769_v53 }
 0x171   : > { %v775_v57 = vshll.u32 %v774_v54, 23  ;;  %v772_v58 = vor.u32 %v771_v56, %v770_v55 }
 0x173   : > { %v776_v59 = vor.u32 4788187, %v775_v57  ;;  %v779_v62 = vcvt.s32.f32 %v772_v58 }
 0x175   : > { %v777_v61 = vand.u32 2147483647, %v776_v59 }
 0x177   : > { %v780_v63 = vmul.f32 %v779_v62, %v777_v61 }
 0x179   : > { %v781_v0 = vxor.u32 2147483648, %v780_v63 }
 0x17b   : > { %v782_v1 = vsel %vm699_vm14, %v781_v0, %v780_v63 }
 0x17c   : > { %v785_v6 = vsel %vm698_vm15, %v1800_v48, %v782_v1  ;;  %v677_v48 = vld [vmem:[%s312_s30] sm:$0x1] }
 0x228   : > { %v670_v2 = vpop.f32.mrb[0].mxu0 }
 0x229   : > { %v674_v3 = vmul.f32 1.442695, %v670_v2  ;;  %v1216_v4 = vpop.f32.mrb[1].mxu0 }
 0x22b   : > { %1380 = vpow2.f32 %v674_v3 }
 0x22c   : > { %1382 = vcosq.f32 %v785_v6 }
 0x22d   : > { %1384 = vsinq.f32 %v785_v6 }
 0x235   : > { %v1381_v12 = vpop.eup %1380 }
 0x236   : > { %v1383_v13 = vpop.eup %1382  ;;  %v678_v60 = vsub.f32 0.0, %v1381_v12 }
 0x237   : > { %v1385_v14 = vpop.eup %1384  ;;  %v797_v20 = vxor.u32 2147483648, %v1383_v13 }
 0x238   : > { %v685_v16 = vmul.f32 %v683_v11, %v678_v60  ;;  %v794_v19 = vxor.u32 2147483648, %v1385_v14 }
 0x239   : > { %v798_v22 = vsel %vm796_vm0, %v797_v20, %v1385_v14 }
 0x23a   : > { %v686_v17 = vmul.f32 1.442695, %v685_v16  ;;  %v795_v21 = vsel %vm793_vm5, %v1383_v13, %v794_v19 }
 0x23b   : > { %v799_v25 = vsel %vm792_vm3, %v795_v21, %v798_v22 }
 0x23c   : > { %1386 = vpow2.f32 %v686_v17  ;;  %v800_v27 = vsel %vm789_vm4, nan, %v799_v25 }
 0x23d   : > { %v801_v30 = vmul.f32 0.5, %v800_v27 }
 0x23f   : > { %v802_v33 = vsub.f32 0.5, %v801_v30 }
 0x241   : > { %v803_v36 = vsel %vm692_vm6, 1.0, %v802_v33 }
 0x242   : > { %v805_v39 = vsel %vm804_vm7, 0.0, %v803_v36 }
 0x246   : > { %v1387_v28 = vpop.eup %1386 }
 0x247   : > { %v689_v29 = vrot.slane %v1387_v28, 1 }
 0x249   : > { %v691_v32 = vmul.f32 %v1381_v12, %v689_v29 }
 0x24b   : > { %v813_v34 = vrot.slane %v691_v32, %v812_v31 }
 0x24d   : > { %v820_v35 = vrot.slane %v813_v34, %v812_v31 }
 0x24f   : > { %v821_v37 = vcombine.high %v820_v35, %v820_v35 }
 0x251   : > { %v823_v38 = vmul.f32 %v821_v37, %v677_v48 }
 0x253   : > { %v824_v18 = vsub.f32 %v691_v32, %v823_v38 }
 0x255   : > { %v825_v40 = vmul.f32 %v824_v18, %v805_v39 }
 0x257   : > { %1250 = vmatmul.mubr.f32.vlgmr.msra.gmra.mrb[0].mxu1 %v825_v40 }
 0x32a   : > { %v893_v42 = vpop.f32.mrb[0].mxu1 }
 0x32b   : > { %v897_v43 = vadd.f32 %v893_v42, %v826_v41  ;;  %v1251_v44 = vpop.f32.mrb[1].mxu1 }
 0x32d   : > { %898 = vst [vmem:[#allocation6] sm:$0x1] %v897_v43 }
 0x32e   : > { %1429 = shalt.err (!%p1426_p1)
}
 0x32f   : > { %s1430_s8 = scalar_lea.hbm %s1876_s7, 16 }
 0x330   : > { %p1431_p5 = scmp.ne.s32.totalorder %s1876_s7, %s1430_s8  ;;  %p1436_p8 = scmp.lt.u32.totalorder %s1430_s8, %s1876_s7 }
 0x332   : > { %p1432_p7 = pnand %p1431_p5, %p1350_p4 }
 0x334   : > { %p1433_p9 = pneg %p1432_p7 }
 0x336   : > { %p1438_p2 = pnand %p1436_p8, %p1433_p9 }
 0x338   : > { %1441 = shalt.err (!%p1438_p2)
}
 0x339   : > { %1341 = dma.vmem_to_hbm [thread:$0]  (%p1350_p4), %s907_s27, 16, %s1876_s7, [#allocation5]  }
 0x33a   : > { %1451 = dma.done.wait (%p1350_p4), [#allocation5], 16  }
 0x33b   : > { %1453 = vsyncadd (%p1350_p4), [#allocation5], 4294967280 }
 0x33c PF: > { %s19_s24 = sadd.s32 1, %s1456_s24  }
 0x33d   : > { %p16_p3 = scmp.ge.s32.totalorder %s19_s24, 4  }
 0x33f   :  { %18 = sbr.rel (!%p16_p3) target bundleno = 2 (0x2), region = 93 }
 0x346   :  { %919 = vsyncpa [#allocation4], 1 }
 0x347   :  { %921 = vsyncpa [#allocation4 + $0x1], 1 }
 0x348   :  { %922 = vsyncpa [#allocation5], 1 }
 0x349   :  { %924 = vsyncpa [#allocation5 + $0x1], 1 }

</bundles_post_ra>
